<compile_context>
chip_gen: v6e
topology: v6e:2x2x1
jax: 0.10.0
libtpu: 0.0.40
codegen_flags: <defaults>
</compile_context>

<pallas_src>
import numpy as np
import jax
import jax.numpy as jnp
from jax.experimental import pallas as pl
from jax.experimental.pallas import tpu as pltpu


def build_pe_table(d_model: int, max_len: int = 30, dtype=jnp.float32) -> jnp.ndarray:
    """Deterministic construction of the (max_len, d_model) positional table."""
    assert d_model % 2 == 0, "d_model must be even (same limitation as the reference)"
    pe = np.zeros((max_len, d_model), dtype=np.float32)
    position = np.arange(0, max_len, dtype=np.float32)[:, None]            # (max_len, 1)
    div_term = 10000.0 ** (-(np.arange(0, d_model, 2, dtype=np.float32) / d_model))
    pe[:, 0::2] = np.sin(position * div_term)
    pe[:, 1::2] = np.cos(position * div_term)
    return jnp.asarray(pe, dtype=dtype)


def _pos_enc_kernel(x_ref, pe_ref, o_ref):
    # x_ref:  (rows_blk, C) flattened activations
    # pe_ref: (1, C)        positional row, broadcast over the row (sublane) axis
    # o_ref:  (rows_blk, C)
    o_ref[...] = x_ref[...] + pe_ref[...]


def positional_encoding(x: jnp.ndarray, pe_full: jnp.ndarray) -> jnp.ndarray:
    """x: (B, S, D).  pe_full: (max_len, D).  Returns x + pe[:S] (dropout = identity)."""
    B, S, D = x.shape
    max_len, d_model = pe_full.shape
    assert d_model == D, f"pe table d_model={d_model} != activation D={D}"
    assert S <= max_len, f"sequence length {S} exceeds max_len {max_len}"

    # Lane-dense flatten: last dim becomes S*D (>=128 and a multiple of 128 for
    # typical ViT dims) so every vector store is a full-width unmasked vst.
    C = S * D
    x2 = x.reshape(B, C)
    pe2 = pe_full[:S].astype(x.dtype).reshape(1, C)   # add happens in x.dtype

    itemsize = int(jnp.dtype(x.dtype).itemsize)
    row_bytes = C * itemsize

    # Coarse grid: cover as many rows per step as fit a ~4 MiB block; a single
    # step at small shapes.  When tiling, the row-block must obey the sublane
    # rule (multiple of 8) unless it equals the full dim.
    target_block_bytes = 4 * 1024 * 1024
    rows_per_block = max(1, target_block_bytes // max(1, row_bytes))
    if rows_per_block >= B:
        rows_per_block = B                      # full-extent block: always legal
    else:
        rows_per_block = max(8, (rows_per_block // 8) * 8)
    grid = (pl.cdiv(B, rows_per_block),)

    # Explicit VMEM budget: 2x(x) + 2x(out) double-buffered blocks + pe + slack.
    # Kept <= 64 MiB so the same kernel is safe on v7x (half of v5e/v6e VMEM).
    block_bytes = rows_per_block * row_bytes
    vmem_limit_bytes = int(min(64 << 20,
                               max(16 << 20, 4 * block_bytes + 2 * row_bytes + (2 << 20))))

    out2 = pl.pallas_call(
        _pos_enc_kernel,
        out_shape=jax.ShapeDtypeStruct((B, C), x.dtype),
        grid_spec=pltpu.PrefetchScalarGridSpec(
            num_scalar_prefetch=0,
            grid=grid,
            in_specs=[
                pl.BlockSpec((rows_per_block, C), lambda r: (r, 0)),   # activations
                pl.BlockSpec((1, C), lambda r: (0, 0)),                # constant pe row
            ],
            out_specs=pl.BlockSpec((rows_per_block, C), lambda r: (r, 0)),
        ),
        compiler_params=pltpu.CompilerParams(
            dimension_semantics=("parallel",),
            vmem_limit_bytes=vmem_limit_bytes,
        ),
        input_output_aliases={0: 0},             # output reuses x's HBM buffer
    )(x2, pe2)
    # TODO(synk): training-mode dropout (nn.Dropout) is omitted — eval-mode identity.
    return out2.reshape(B, S, D)


if __name__ == "__main__":
    d_model = 32
    max_len = 30
    batch = 2
    seq = 8

    key = jax.random.PRNGKey(0)
    x = jax.random.normal(key, (batch, seq, d_model), dtype=jnp.float32)

    pe_full = build_pe_table(d_model, max_len)

    # Reference computed up-front in plain JAX.
    ref = x + pe_full[:seq][None, :, :]

    out = positional_encoding(x, pe_full)
    out = jax.block_until_ready(out)

    np.testing.assert_allclose(np.asarray(out), np.asarray(ref), rtol=1e-6, atol=1e-6)

    print("KERNEL_OK")
</pallas_src>

<mosaic_0001>
module attributes {stable_mosaic.version = 11 : i64} {
  func.func @_pos_enc_kernel(%arg0: i32, %arg1: memref<2x256xf32, #tpu.memory_space<vmem>>, %arg2: memref<1x256xf32, #tpu.memory_space<vmem>>, %arg3: memref<2x256xf32, #tpu.memory_space<vmem>>) attributes {dimension_semantics = [#tpu.dimension_semantics<parallel>], iteration_bounds = array<i64: 1>, scalar_prefetch = 0 : i64, scratch_operands = 0 : i64, tpu.core_type = #tpu.core_type<tc>, window_params = [{transform_indices = @transform_0, window_bounds = array<i64: 2, 256>}, {pipeline_mode = #tpu.pipeline_mode<synchronous>, transform_indices = @transform_1, window_bounds = array<i64: 1, 256>}, {transform_indices = @transform_2, window_bounds = array<i64: 2, 256>}]} {
    %c0 = arith.constant 0 : index
    %c0_0 = arith.constant 0 : index
    %0 = vector.load %arg1[%c0, %c0_0] : memref<2x256xf32, #tpu.memory_space<vmem>>, vector<2x256xf32>
    %c0_1 = arith.constant 0 : index
    %c0_2 = arith.constant 0 : index
    %1 = vector.load %arg2[%c0_1, %c0_2] : memref<1x256xf32, #tpu.memory_space<vmem>>, vector<1x256xf32>
    %2 = vector.broadcast %1 : vector<1x256xf32> to vector<2x256xf32>
    %3 = arith.addf %0, %2 : vector<2x256xf32>
    %c0_3 = arith.constant 0 : index
    %c0_4 = arith.constant 0 : index
    %4 = vector.load %arg3[%c0_3, %c0_4] : memref<2x256xf32, #tpu.memory_space<vmem>>, vector<2x256xf32>
    tpu.vector_store %arg3[%c0_3, %c0_4], %3 {strides = array<i32>} : memref<2x256xf32, #tpu.memory_space<vmem>>, vector<2x256xf32>,
    return
  }
  func.func @transform_0(%arg0: i32) -> (i32, i32) {
    %c0_i32 = arith.constant 0 : i32
    %c0_i32_0 = arith.constant 0 : i32
    return %arg0, %c0_i32 : i32, i32
  }
  func.func @transform_1(%arg0: i32) -> (i32, i32) {
    %c0_i32 = arith.constant 0 : i32
    %c0_i32_0 = arith.constant 0 : i32
    %c0_i32_1 = arith.constant 0 : i32
    return %c0_i32, %c0_i32_0 : i32, i32
  }
  func.func @transform_2(%arg0: i32) -> (i32, i32) {
    %c0_i32 = arith.constant 0 : i32
    %c0_i32_0 = arith.constant 0 : i32
    return %arg0, %c0_i32 : i32, i32
  }
}

</mosaic_0001>

<bundles_post_ra>
// kernel: tpu_custom_call.1
= control target key start
LH: loop header
LB: loop body
LE: loop exit
PB: predicated region body
PF: predicated region fallthrough
CT: control target
= control target key end

     0   :  { %7 = vsyncpa [#allocation3], 0  ;;  %s135_s0 = inlined_call_operand.hbm [shape: f32[2,256], index: 0, kind: input, shape index: {}, may-alias: {0,2}]   ;;  %s136_s1 = inlined_call_operand.vmem [shape: f32[1,256], index: 1, kind: input, shape index: {}]   ;;  %s137_s2 = inlined_call_operand.hbm [shape: f32[2,256], index: 2, kind: output, shape index: {}, may-alias: {0,2}]  }
   0x1   :  { %8 = vsyncpa [#allocation4], 0  ;;  %s108_s9 = smov [#allocation2]  }
   0x2   :  { %s15_s10 = sshll.u32 %s108_s9, 4  ;;  %s16_s10 = int_to_ptr.vmem [resolvable:$true] %s15_s10 }
   0x3   :  { %s72_s11 = scalar_lea.vmem %s16_s10, 64  ;;  %p77_p1 = scmp.lt.s32.totalorder %s16_s10, %s16_s10 }
   0x4   :  { %p73_p0 = scmp.ne.s32.totalorder %s16_s10, %s72_s11  ;;  %p78_p2 = scmp.lt.s32.totalorder %s72_s11, %s72_s11 }
   0x6   :  { %p79_p3 = por %p78_p2, %p77_p1 }
   0x8   :  { %p80_p4 = pnand %p79_p3, %p73_p0 }
   0xa   :  { %83 = shalt.err (!%p80_p4)
}
   0xb   :  { %18 = dma.hbm_to_vmem [thread:$0]  %s135_s0, 64, %s16_s10, [#allocation3]  }
   0xc   :  { %104 = dma.done.wait [#allocation3], 64  }
   0xd   :  { %105 = vsyncadd [#allocation3], 4294967232  ;;  %v27_v0 = vlaneseq  ;;  %v109_v1 = vmov 1983009808   ;;  %v25_v7 = vld [vmem:[%s136_s1] sm:$0x3] }
   0xe   :  { %v37_v2 = vunpack.c.l.s4 %v109_v1  ;;  %v24_v12 = vld [vmem:[#allocation2] sm:$0xf]  ;;  %s110_s16 = smov [#allocation5]  }
   0xf   :  { %v28_v3 = vshrl.u32 %v27_v0, 7  ;;  %s52_s0 = sshll.u32 %s110_s16, 4  ;;  %s53_s0 = int_to_ptr.vmem [resolvable:$true] %s52_s0 }
  0x10   :  { %v38_v6 = vunpack.c.0.s8 %v37_v2  ;;  %s84_s17 = scalar_lea.vmem %s53_s0, 64  ;;  %p89_p6 = scmp.lt.s32.totalorder %s53_s0, %s53_s0 }
  0x11   :  { %v29_v4 = vsub.s32 0, %v28_v3  ;;  %v33_v5 = vsub.s32 1, %v28_v3  ;;  %p85_p5 = scmp.ne.s32.totalorder %s53_s0, %s84_s17  ;;  %p90_p7 = scmp.lt.s32.totalorder %s84_s17, %s84_s17 }
  0x12   :  { %v41_v10 = vsub.s32 %v38_v6, %v28_v3 }
  0x13   :  { %v30_v8 = vrot.slane %v25_v7, %v29_v4  ;;  %v34_v9 = vrot.slane %v25_v7, %v33_v5  ;;  %p91_p8 = por %p90_p7, %p89_p6 }
  0x15   :  { %v35_v11 = vcombine.low %v30_v8, %v34_v9  ;;  %p92_p9 = pnand %p91_p8, %p85_p5 }
  0x17   :  { %v42_v13 = vrot.slane %v35_v11, %v41_v10 }
  0x19   :  { %v44_v14 = vadd.f32 %v42_v13, %v24_v12 }
  0x1b   :  { %45 = vst [vmem:[#allocation5] sm:$0xf] %v44_v14 }
  0x1c   :  { %95 = shalt.err (!%p92_p9)
}
  0x1d   :  { %55 = dma.vmem_to_hbm [thread:$0]  %s53_s0, 64, %s137_s2, [#allocation4]  }
  0x1e   :  { %106 = dma.done.wait [#allocation4], 64  }
  0x1f   :  { %107 = vsyncadd [#allocation4], 4294967232 }
  0x20   :  { %59 = vsyncpa [#allocation3], 1 }
  0x21   :  { %60 = vsyncpa [#allocation4], 1 }

</bundles_post_ra>
